<compile_context>
chip_gen: v5e
topology: v5e:2x2
jax: 0.10.0
libtpu: 0.0.40
codegen_flags: <defaults>
</compile_context>

<pallas_src>
import jax
import jax.numpy as jnp
from jax.experimental import pallas as pl
from jax.experimental.pallas import tpu as pltpu


def _duc_kernel(x_ref, top_ref, bot_ref, w_ref, scale_ref, bias_ref, out_ref):
    """Fused 3x3 conv (pad=1, no bias) + folded BN + ReLU on one (TH, W) row block.

    x_ref    : (TH, W*Cin)        bf16  current row block, lane-packed (w, cin)
    top_ref  : (8,  W*Cin)        bf16  8-row block whose row 7 is the row above this block
    bot_ref  : (8,  W*Cin)        bf16  8-row block whose row 0 is the row below this block
    w_ref    : (3, W*Cin, W*Cout) bf16  banded (Toeplitz over kw) conv weights, one per kh
    scale_ref: (1, W*Cout)        f32   folded BN scale, tiled over w
    bias_ref : (1, W*Cout)        f32   folded BN bias,  tiled over w
    out_ref  : (TH, W*Cout)       f32
    """
    i = pl.program_id(1)
    nh = pl.num_programs(1)
    th = x_ref.shape[0]

    x = x_ref[...]                                        # (TH, W*Cin)

    # Halo rows, zeroed at the top/bottom image borders (realises the H zero padding).
    top_keep = jnp.where(i > 0, 1.0, 0.0).astype(x.dtype)
    bot_keep = jnp.where(i < nh - 1, 1.0, 0.0).astype(x.dtype)
    top_row = top_ref[7:8, :] * top_keep                  # (1, W*Cin)
    bot_row = bot_ref[0:1, :] * bot_keep                  # (1, W*Cin)

    # Row-shifted LHS slabs: source rows h-1 / h / h+1 for every output row h.
    lhs_up = jnp.concatenate([top_row, x[: th - 1, :]], axis=0)
    lhs_dn = jnp.concatenate([x[1:, :], bot_row], axis=0)

    # 3 MXU matmuls (K = W*Cin, N = W*Cout); kw taps + W padding are folded into the RHS.
    acc = jnp.dot(lhs_up, w_ref[0], preferred_element_type=jnp.float32)
    acc += jnp.dot(x, w_ref[1], preferred_element_type=jnp.float32)
    acc += jnp.dot(lhs_dn, w_ref[2], preferred_element_type=jnp.float32)

    # Folded BatchNorm (inference) + ReLU; f32 elementwise (v5e-safe), lane-dense store.
    y = acc * scale_ref[...] + bias_ref[...]
    out_ref[...] = jnp.maximum(y, 0.0).astype(out_ref.dtype)


def _pick_tile_h(H, w_cin, w_cout, budget_bytes=4 * 1024 * 1024):
    """Largest multiple-of-8 divisor of H whose double-buffered block I/O fits the budget
    (budget sized well under v7x's 32 MiB scoped VMEM)."""
    best = 8
    for th in range(8, H + 1, 8):
        if H % th:
            continue
        foot = 2 * (th * w_cin * 2 + 2 * 8 * w_cin * 2) + 2 * (th * w_cout * 4)
        if foot <= budget_bytes:
            best = th
    return best


def _build_banded_weights(w_oihw, W):
    """OIHW (Cout, Cin, 3, 3) -> (3, W*Cin, W*Cout) banded-over-kw matrices.

    wt[kh, wi*Cin + ci, wo*Cout + co] = w[co, ci, kh, wi - wo + 1]   (0 outside the band),
    which also realises the width-direction zero padding implicitly.
    """
    Cout, Cin = w_oihw.shape[0], w_oihw.shape[1]
    wk = jnp.transpose(w_oihw, (2, 3, 1, 0)).astype(jnp.float32)        # (3, 3, Cin, Cout)
    wi = jnp.arange(W)[:, None]
    wo = jnp.arange(W)[None, :]
    kw = wi - wo + 1                                                     # (W, W)
    valid = ((kw >= 0) & (kw < 3)).astype(jnp.float32)
    kw_c = jnp.clip(kw, 0, 2)
    banded = wk[:, kw_c, :, :] * valid[None, :, :, None, None]           # (3, Wi, Wo, Cin, Cout)
    banded = jnp.transpose(banded, (0, 1, 3, 2, 4))                      # (3, Wi, Cin, Wo, Cout)
    return banded.reshape(3, W * Cin, W * Cout)


def duc_forward(x_nchw, w_oihw, gamma, beta, run_mean, run_var,
                upscale_factor=2, eps=1e-5, tile_h=None):
    """Full DUC forward. x_nchw: (N, Cin, H, W); w_oihw: (planes, Cin, 3, 3). Returns NCHW."""
    N, Cin, H, W = x_nchw.shape
    Cout = w_oihw.shape[0]
    r = upscale_factor
    assert Cout % (r * r) == 0
    if H % 8 != 0:
        # TODO(synk): ragged H (not a multiple of the 8-sublane tile) needs masked row blocks.
        raise NotImplementedError("H must be a multiple of 8")

    w_cin, w_cout = W * Cin, W * Cout
    th = tile_h if tile_h is not None else _pick_tile_h(H, w_cin, w_cout)
    assert H % th == 0 and th % 8 == 0
    nh = H // th
    hb = th // 8                      # 8-row sub-blocks per row block (halo addressing)

    # --- fold BatchNorm (inference) into per-channel scale / bias -------------------------
    scale = (gamma / jnp.sqrt(run_var + eps)).astype(jnp.float32)
    bias = (beta - run_mean * scale).astype(jnp.float32)
    scale_t = jnp.tile(scale, W).reshape(1, w_cout)       # index w*Cout + co -> scale[co]
    bias_t = jnp.tile(bias, W).reshape(1, w_cout)

    # --- lane-dense bf16 operands ----------------------------------------------------------
    # NCHW -> NHWC -> (N, H, W*Cin) row slabs (free reshape); bf16 inputs, f32 accumulation.
    x_slab = jnp.transpose(x_nchw, (0, 2, 3, 1)).reshape(N, H, w_cin).astype(jnp.bfloat16)
    w_banded = _build_banded_weights(w_oihw, W).astype(jnp.bfloat16)     # (3, W*Cin, W*Cout)

    in_specs = [
        # current row block
        pl.BlockSpec((None, th, w_cin), lambda n, i: (n, i, 0)),
        # 8-row-aligned block holding the row just above this block (clamped at the top)
        pl.BlockSpec((None, 8, w_cin), lambda n, i: (n, jnp.maximum(i * hb - 1, 0), 0)),
        # 8-row-aligned block holding the row just below this block (clamped at the bottom)
        pl.BlockSpec((None, 8, w_cin), lambda n, i: (n, jnp.minimum((i + 1) * hb, H // 8 - 1), 0)),
        # weights / BN params: resident, constant block index
        pl.BlockSpec((3, w_cin, w_cout), lambda n, i: (0, 0, 0)),
        pl.BlockSpec((1, w_cout), lambda n, i: (0, 0)),
        pl.BlockSpec((1, w_cout), lambda n, i: (0, 0)),
    ]
    out_specs = pl.BlockSpec((None, th, w_cout), lambda n, i: (n, i, 0))

    y_slab = pl.pallas_call(
        _duc_kernel,
        out_shape=jax.ShapeDtypeStruct((N, H, w_cout), jnp.float32),
        grid=(N, nh),
        in_specs=in_specs,
        out_specs=out_specs,
        compiler_params=pltpu.CompilerParams(
            dimension_semantics=("parallel", "parallel"),
            vmem_limit_bytes=32 * 1024 * 1024,   # keep within v7x's scoped VMEM
        ),
    )(x_slab, x_slab, x_slab, w_banded, scale_t, bias_t)

    # --- PixelShuffle (pure layout) + back to NCHW -----------------------------------------
    co = Cout // (r * r)
    y = y_slab.reshape(N, H, W, co, r, r)                 # [..., co, i, j]
    y = jnp.transpose(y, (0, 3, 1, 4, 2, 5))              # (N, co, H, i, W, j)
    return y.reshape(N, co, H * r, W * r)


def _pixel_shuffle_nchw_ref(y, r):
    N, C, H, W = y.shape
    co = C // (r * r)
    y = y.reshape(N, co, r, r, H, W)
    y = y.transpose(0, 1, 4, 2, 5, 3)
    return y.reshape(N, co, H * r, W * r)


if __name__ == "__main__":
    # Small shapes consistent with the module: inplanes=4, planes=16, upscale=2.
    N, Cin, H, W = 2, 4, 16, 16
    planes, r = 16, 2

    key = jax.random.PRNGKey(0)
    k_x, k_w, k_g, k_b, k_m, k_v = jax.random.split(key, 6)
    x = jax.random.normal(k_x, (N, Cin, H, W), jnp.float32)
    w = jax.random.normal(k_w, (planes, Cin, 3, 3), jnp.float32) * 0.1
    gamma = 1.0 + 0.1 * jax.random.normal(k_g, (planes,), jnp.float32)
    beta = 0.1 * jax.random.normal(k_b, (planes,), jnp.float32)
    run_mean = 0.1 * jax.random.normal(k_m, (planes,), jnp.float32)
    run_var = 1.0 + 0.1 * jnp.abs(jax.random.normal(k_v, (planes,), jnp.float32))

    # tile_h=8 -> grid (2, 2): exercises the row-halo (multi H-block) path.
    out = duc_forward(x, w, gamma, beta, run_mean, run_var, upscale_factor=r, tile_h=8)
    out = jax.block_until_ready(out)
    assert out.shape == (N, planes // (r * r), H * r, W * r), out.shape

    # Pure-JAX reference (XLA conv) on the same bf16-rounded operands, f32 accumulation.
    eps = 1e-5
    x_q = x.astype(jnp.bfloat16).astype(jnp.float32)
    w_q = w.astype(jnp.bfloat16).astype(jnp.float32)
    scale = gamma / jnp.sqrt(run_var + eps)
    bias = beta - run_mean * scale
    conv = jax.lax.conv_general_dilated(
        x_q, w_q, window_strides=(1, 1), padding="SAME",
        dimension_numbers=("NCHW", "OIHW", "NCHW"))
    ref = jnp.maximum(conv * scale[None, :, None, None] + bias[None, :, None, None], 0.0)
    ref = _pixel_shuffle_nchw_ref(ref, r)
    err = float(jnp.max(jnp.abs(out - ref)))
    assert err < 2e-3, err

    print("KERNEL_OK")
</pallas_src>

<mosaic_0001>
module attributes {stable_mosaic.version = 11 : i64} {
  func.func @_duc_kernel(%arg0: i32, %arg1: i32, %arg2: memref<1x8x64xbf16, #tpu.memory_space<vmem>>, %arg3: memref<1x8x64xbf16, #tpu.memory_space<vmem>>, %arg4: memref<1x8x64xbf16, #tpu.memory_space<vmem>>, %arg5: memref<3x64x256xbf16, #tpu.memory_space<vmem>>, %arg6: memref<1x256xf32, #tpu.memory_space<vmem>>, %arg7: memref<1x256xf32, #tpu.memory_space<vmem>>, %arg8: memref<1x8x256xf32, #tpu.memory_space<vmem>>) attributes {dimension_semantics = [#tpu.dimension_semantics<parallel>, #tpu.dimension_semantics<parallel>], iteration_bounds = array<i64: 2, 2>, scalar_prefetch = 0 : i64, scratch_operands = 0 : i64, tpu.core_type = #tpu.core_type<tc>, window_params = [{transform_indices = @transform_0, window_bounds = array<i64: 1, 8, 64>}, {transform_indices = @transform_1, window_bounds = array<i64: 1, 8, 64>}, {transform_indices = @transform_2, window_bounds = array<i64: 1, 8, 64>}, {pipeline_mode = #tpu.pipeline_mode<synchronous>, transform_indices = @transform_3, window_bounds = array<i64: 3, 64, 256>}, {pipeline_mode = #tpu.pipeline_mode<synchronous>, transform_indices = @transform_4, window_bounds = array<i64: 1, 256>}, {pipeline_mode = #tpu.pipeline_mode<synchronous>, transform_indices = @transform_5, window_bounds = array<i64: 1, 256>}, {transform_indices = @transform_6, window_bounds = array<i64: 1, 8, 256>}]} {
    %c0 = arith.constant 0 : index
    %c0_0 = arith.constant 0 : index
    %c0_1 = arith.constant 0 : index
    %0 = vector.load %arg2[%c0, %c0_0, %c0_1] : memref<1x8x64xbf16, #tpu.memory_space<vmem>>, vector<1x8x64xbf16>
    %1 = vector.shape_cast %0 : vector<1x8x64xbf16> to vector<8x64xbf16>
    %c0_i32 = arith.constant 0 : i32
    %2 = arith.cmpi sgt, %arg1, %c0_i32 : i32
    %cst = arith.constant 1.000000e+00 : f32
    %cst_2 = arith.constant 0.000000e+00 : f32
    %3 = arith.select %2, %cst, %cst_2 : f32
    %4 = arith.truncf %3 : f32 to bf16
    %c1_i32 = arith.constant 1 : i32
    %5 = arith.cmpi slt, %arg1, %c1_i32 : i32
    %cst_3 = arith.constant 1.000000e+00 : f32
    %cst_4 = arith.constant 0.000000e+00 : f32
    %6 = arith.select %5, %cst_3, %cst_4 : f32
    %7 = arith.truncf %6 : f32 to bf16
    %c0_5 = arith.constant 0 : index
    %c7 = arith.constant 7 : index
    %c0_6 = arith.constant 0 : index
    %8 = vector.load %arg3[%c0_5, %c7, %c0_6] : memref<1x8x64xbf16, #tpu.memory_space<vmem>>, vector<1x1x64xbf16>
    %9 = vector.shape_cast %8 : vector<1x1x64xbf16> to vector<1x64xbf16>
    %10 = vector.broadcast %4 : bf16 to vector<1x64xbf16>
    %11 = arith.mulf %9, %10 : vector<1x64xbf16>
    %c0_7 = arith.constant 0 : index
    %c0_8 = arith.constant 0 : index
    %c0_9 = arith.constant 0 : index
    %12 = vector.load %arg4[%c0_7, %c0_8, %c0_9] : memref<1x8x64xbf16, #tpu.memory_space<vmem>>, vector<1x1x64xbf16>
    %13 = vector.shape_cast %12 : vector<1x1x64xbf16> to vector<1x64xbf16>
    %14 = vector.broadcast %7 : bf16 to vector<1x64xbf16>
    %15 = arith.mulf %13, %14 : vector<1x64xbf16>
    %16 = vector.extract_strided_slice %1 {offsets = [0, 0], sizes = [7, 64], strides = [1, 1]} : vector<8x64xbf16> to vector<7x64xbf16>
    %17 = tpu.concatenate %11, %16 in 0 : vector<1x64xbf16>, vector<7x64xbf16> -> vector<8x64xbf16>
    %18 = vector.extract_strided_slice %1 {offsets = [1, 0], sizes = [7, 64], strides = [1, 1]} : vector<8x64xbf16> to vector<7x64xbf16>
    %19 = tpu.concatenate %18, %15 in 0 : vector<7x64xbf16>, vector<1x64xbf16> -> vector<8x64xbf16>
    %c0_10 = arith.constant 0 : index
    %c0_11 = arith.constant 0 : index
    %c0_12 = arith.constant 0 : index
    %20 = vector.load %arg5[%c0_10, %c0_11, %c0_12] : memref<3x64x256xbf16, #tpu.memory_space<vmem>>, vector<1x64x256xbf16>
    %21 = vector.shape_cast %20 : vector<1x64x256xbf16> to vector<64x256xbf16>
    %cst_13 = arith.constant dense<0.000000e+00> : vector<8x256xf32>
    %22 = tpu.matmul %17, %21, %cst_13 {dimension_numbers = #tpu.dot_dimension_numbers<[1], [0], [0], [1], [0, 0, 1, 1], [], []>} : vector<8x64xbf16>, vector<64x256xbf16>, vector<8x256xf32> -> vector<8x256xf32>
    %c1 = arith.constant 1 : index
    %c0_14 = arith.constant 0 : index
    %c0_15 = arith.constant 0 : index
    %23 = vector.load %arg5[%c1, %c0_14, %c0_15] : memref<3x64x256xbf16, #tpu.memory_space<vmem>>, vector<1x64x256xbf16>
    %24 = vector.shape_cast %23 : vector<1x64x256xbf16> to vector<64x256xbf16>
    %cst_16 = arith.constant dense<0.000000e+00> : vector<8x256xf32>
    %25 = tpu.matmul %1, %24, %cst_16 {dimension_numbers = #tpu.dot_dimension_numbers<[1], [0], [0], [1], [0, 0, 1, 1], [], []>} : vector<8x64xbf16>, vector<64x256xbf16>, vector<8x256xf32> -> vector<8x256xf32>
    %26 = arith.addf %22, %25 : vector<8x256xf32>
    %c2 = arith.constant 2 : index
    %c0_17 = arith.constant 0 : index
    %c0_18 = arith.constant 0 : index
    %27 = vector.load %arg5[%c2, %c0_17, %c0_18] : memref<3x64x256xbf16, #tpu.memory_space<vmem>>, vector<1x64x256xbf16>
    %28 = vector.shape_cast %27 : vector<1x64x256xbf16> to vector<64x256xbf16>
    %cst_19 = arith.constant dense<0.000000e+00> : vector<8x256xf32>
    %29 = tpu.matmul %19, %28, %cst_19 {dimension_numbers = #tpu.dot_dimension_numbers<[1], [0], [0], [1], [0, 0, 1, 1], [], []>} : vector<8x64xbf16>, vector<64x256xbf16>, vector<8x256xf32> -> vector<8x256xf32>
    %30 = arith.addf %26, %29 : vector<8x256xf32>
    %c0_20 = arith.constant 0 : index
    %c0_21 = arith.constant 0 : index
    %31 = vector.load %arg6[%c0_20, %c0_21] : memref<1x256xf32, #tpu.memory_space<vmem>>, vector<1x256xf32>
    %32 = vector.broadcast %31 : vector<1x256xf32> to vector<8x256xf32>
    %33 = arith.mulf %30, %32 : vector<8x256xf32>
    %c0_22 = arith.constant 0 : index
    %c0_23 = arith.constant 0 : index
    %34 = vector.load %arg7[%c0_22, %c0_23] : memref<1x256xf32, #tpu.memory_space<vmem>>, vector<1x256xf32>
    %35 = vector.broadcast %34 : vector<1x256xf32> to vector<8x256xf32>
    %36 = arith.addf %33, %35 : vector<8x256xf32>
    %cst_24 = arith.constant 0.000000e+00 : f32
    %37 = vector.broadcast %cst_24 : f32 to vector<8x256xf32>
    %38 = arith.maximumf %36, %37 : vector<8x256xf32>
    %c0_25 = arith.constant 0 : index
    %c0_26 = arith.constant 0 : index
    %c0_27 = arith.constant 0 : index
    %39 = vector.load %arg8[%c0_25, %c0_26, %c0_27] : memref<1x8x256xf32, #tpu.memory_space<vmem>>, vector<1x8x256xf32>
    %40 = vector.shape_cast %39 : vector<1x8x256xf32> to vector<8x256xf32>
    %41 = vector.shape_cast %38 : vector<8x256xf32> to vector<1x8x256xf32>
    tpu.vector_store %arg8[%c0_25, %c0_26, %c0_27], %41 {strides = array<i32>} : memref<1x8x256xf32, #tpu.memory_space<vmem>>, vector<1x8x256xf32>,
    return
  }
  func.func @transform_0(%arg0: i32, %arg1: i32) -> (i32, i32, i32) {
    %c0_i32 = arith.constant 0 : i32
    %c0_i32_0 = arith.constant 0 : i32
    return %arg0, %arg1, %c0_i32 : i32, i32, i32
  }
  func.func @transform_1(%arg0: i32, %arg1: i32) -> (i32, i32, i32) {
    %c1_i32 = arith.constant 1 : i32
    %0 = arith.muli %arg1, %c1_i32 : i32
    %c1_i32_0 = arith.constant 1 : i32
    %1 = arith.subi %0, %c1_i32_0 : i32
    %c0_i32 = arith.constant 0 : i32
    %2 = arith.maxsi %1, %c0_i32 : i32
    %c0_i32_1 = arith.constant 0 : i32
    %c0_i32_2 = arith.constant 0 : i32
    return %arg0, %2, %c0_i32_1 : i32, i32, i32
  }
  func.func @transform_2(%arg0: i32, %arg1: i32) -> (i32, i32, i32) {
    %c1_i32 = arith.constant 1 : i32
    %0 = arith.addi %arg1, %c1_i32 : i32
    %c1_i32_0 = arith.constant 1 : i32
    %1 = arith.muli %0, %c1_i32_0 : i32
    %c1_i32_1 = arith.constant 1 : i32
    %2 = arith.minsi %1, %c1_i32_1 : i32
    %c0_i32 = arith.constant 0 : i32
    %c0_i32_2 = arith.constant 0 : i32
    return %arg0, %2, %c0_i32 : i32, i32, i32
  }
  func.func @transform_3(%arg0: i32, %arg1: i32) -> (i32, i32, i32) {
    %c0_i32 = arith.constant 0 : i32
    %c0_i32_0 = arith.constant 0 : i32
    %c0_i32_1 = arith.constant 0 : i32
    %c0_i32_2 = arith.constant 0 : i32
    return %c0_i32, %c0_i32_0, %c0_i32_1 : i32, i32, i32
  }
  func.func @transform_4(%arg0: i32, %arg1: i32) -> (i32, i32) {
    %c0_i32 = arith.constant 0 : i32
    %c0_i32_0 = arith.constant 0 : i32
    %c0_i32_1 = arith.constant 0 : i32
    return %c0_i32, %c0_i32_0 : i32, i32
  }
  func.func @transform_5(%arg0: i32, %arg1: i32) -> (i32, i32) {
    %c0_i32 = arith.constant 0 : i32
    %c0_i32_0 = arith.constant 0 : i32
    %c0_i32_1 = arith.constant 0 : i32
    return %c0_i32, %c0_i32_0 : i32, i32
  }
  func.func @transform_6(%arg0: i32, %arg1: i32) -> (i32, i32, i32) {
    %c0_i32 = arith.constant 0 : i32
    %c0_i32_0 = arith.constant 0 : i32
    return %arg0, %arg1, %c0_i32 : i32, i32, i32
  }
}

</mosaic_0001>

<bundles_post_ra>
// kernel: tpu_custom_call.1
= control target key start
LH: loop header
LB: loop body
LE: loop exit
PB: predicated region body
PF: predicated region fallthrough
CT: control target
= control target key end

     0   :  { %s1898_s0 = inlined_call_operand.hbm [shape: bf16[2,16,64], index: 0, kind: input, shape index: {}]   ;;  %s1899_s1 = inlined_call_operand.hbm [shape: bf16[2,16,64], index: 1, kind: input, shape index: {}]   ;;  %s1900_s2 = inlined_call_operand.hbm [shape: bf16[2,16,64], index: 2, kind: input, shape index: {}]   ;;  %s1901_s3 = inlined_call_operand.hbm [shape: bf16[3,64,256], index: 3, kind: input, shape index: {}]   ;;  %s1902_s4 = inlined_call_operand.vmem [shape: f32[1,256], index: 4, kind: input, shape index: {}]   ;;  %s1903_s5 = inlined_call_operand.vmem [shape: f32[1,256], index: 5, kind: input, shape index: {}]   ;;  %s1904_s6 = inlined_call_operand.hbm [shape: f32[2,16,256], index: 6, kind: output, shape index: {}]  }
   0x1   :  { %1916 = sst [smem:[#allocation25_spill]] %s1898_s0 }
   0x2   :  { %1917 = sst [smem:[#allocation26_spill]] %s1899_s1 }
   0x3   :  { %1918 = sst [smem:[#allocation27_spill]] %s1900_s2 }
   0x4   :  { %1919 = sst [smem:[#allocation28_spill]] %s1901_s3 }
   0x5   :  { %1920 = sst [smem:[#allocation29_spill]] %s1902_s4 }
   0x6   :  { %1921 = sst [smem:[#allocation30_spill]] %s1903_s5 }
   0x7   :  { %1922 = sst [smem:[#allocation31_spill]] %s1904_s6 }
   0x8   :  { %11 = vsyncpa [#allocation3], 0 }
   0x9   :  { %13 = vsyncpa [#allocation3 + $0x1], 0 }
   0xa   :  { %14 = vsyncpa [#allocation6], 0 }
   0xb   :  { %16 = vsyncpa [#allocation6 + $0x1], 0 }
   0xc   :  { %17 = vsyncpa [#allocation9], 0 }
   0xd   :  { %18 = vsyncpa [#allocation4], 0 }
   0xe   :  { %20 = vsyncpa [#allocation4 + $0x1], 0  ;;  %s1537_s21 = smov 0   ;;  %s1539_s22 = smov 0  }
   0xf   :  { %s1541_s23 = smov 0   ;;  %s1543_s24 = smov 0  }
  0x10   :  { %s1545_s25 = smov 0   ;;  %s1547_s26 = smov 0  }
  0x11   :  { %s1549_s27 = smov 0   ;;  %s1551_s28 = smov 0  }
  0x12   :  { %s1553_s29 = smov 0   ;;  %s1555_s30 = smov 0  }
  0x13   :  { %s1557_s7 = smov 0   ;;  %s1559_s8 = smov 0  }
  0x14   :  { %s1561_s9 = smov 0   ;;  %s1563_s10 = smov 0  }
  0x15 LB: > { %1923 = sst [smem:[#allocation16_spill]] %s1461_s25  ;;  %s1606_s11 = sadd.s32 4294967295, %s1497_s10   ;;  %s1497_s10 = sphi %s1563_s10, %s26_s10   ;;  %s1493_s9 = sphi %s1561_s9, %s1975_s9   ;;  %s1489_s8 = sphi %s1559_s8, %s1962_s8   ;;  %s1485_s7 = sphi %s1557_s7, %s1974_s7   ;;  %s1481_s30 = sphi %s1555_s30, %s1973_s30   ;;  %s1477_s29 = sphi %s1553_s29, %s1972_s29   ;;  %s1473_s28 = sphi %s1551_s28, %s1971_s28   ;;  %s1469_s27 = sphi %s1549_s27, %s1970_s27   ;;  %s1465_s26 = sphi %s1547_s26, %s1969_s26   ;;  %s1461_s25 = sphi %s1545_s25, %s1968_s25   ;;  %s1457_s24 = sphi %s1543_s24, %s1957_s24   ;;  %s1453_s23 = sphi %s1541_s23, %s1967_s23   ;;  %s1449_s22 = sphi %s1539_s22, %s1966_s22   ;;  %s1445_s21 = sphi %s1537_s21, %s1965_s21  }
  0x16   : > { %1924 = sst [smem:[#allocation17_spill]] %s1477_s29  ;;  %s35_s12 = sadd.s32 1, %s1489_s8 }
  0x17   : > { %1925 = sst [smem:[#allocation18_spill]] %s1481_s30  ;;  %p36_p0 = scmp.ge.s32.totalorder %s35_s12, 2 }
  0x18   : > { %1926 = sst [smem:[#allocation19_spill]] %s1485_s7  ;;  %s38_s13 = sadd.s32 1, %s1493_s9 }
  0x19   : > { %1927 = sst [smem:[#allocation20_spill]] %s1489_s8  ;;  %p55_p1 = scmp.eq.s32.totalorder %s1497_s10, 0 }
  0x1a   : > { %p1915_p2 = scmp.eq.s32.totalorder %s1606_s11, 0  ;;  %s1977_s12 = smov (%p36_p0, %s35_s12), 0 }
  0x1b   : > { %1928 = sst [smem:[#allocation21_spill]] %s1977_s12  ;;  %s1979_s13 = smov (!%p36_p0, %s38_s13), %s1493_s9 }
  0x1c   : > { %s43_s14 = ssub.s32 %s1489_s8, %s1977_s12  ;;  %p40_p3 = scmp.ge.s32.totalorder %s1979_s13, 2 }
  0x1d   : > { %s81_s15 = sadd.s32 1, %s1465_s26  ;;  %p88_p4 = scmp.ne.s32.totalorder %s1465_s26, %s1461_s25 }
  0x1e   : > { %s1981_s13 = smov (%p40_p3, %s1979_s13), 0  ;;  %p94_p6 = scmp.ne.s32.totalorder %s1461_s25, %s1457_s24 }
  0x1f   : > { %1929 = sst [smem:[#allocation22_spill]] %s1981_s13  ;;  %s1622_s16 = ssub.s32 %s1493_s9, %s1981_s13 }
  0x20   : > { %s1625_s17 = sor.u32 %s43_s14, %s1622_s16  ;;  %p1633_p7 = por %p88_p4, %p55_p1 }
  0x21   : > { %p45_p5 = scmp.eq.s32.totalorder %s1625_s17, 0  ;;  %p1639_p8 = por %p94_p6, %p1915_p2 }
  0x22   : > { %p1913_p9 = scmp.eq.s32.totalorder %s1622_s16, 0  ;;  %p1097_p10 = scmp.lt.s32.totalorder %s1497_s10, 4 }
  0x23   : > { %s284_s14 = sand.u32 1, %s1497_s10   ;;  %s286_s24 = sand.u32 1, %s1465_s26  }
  0x24   : > { %s1650_s13 = scalar_select %p1913_p9, %s1465_s26, %s81_s15  }
  0x25   : > { %s921_s12 = sshll.u32 %s286_s24, 2  ;;  %s1911_s6 = sshll.u32 %s1493_s9, 3 }
  0x26   : > { %1932 = sst [smem:[#allocation23_spill]] %s1650_s13  ;;  %s288_s30 = scalar_lea.vmem [#allocation5], %s921_s12 }
  0x27   : > { %s1933_s1 = sld [smem:[#allocation26_spill]]  ;;  %s301_s25 = sshll.u32 %s288_s30, 4  ;;  %s302_s25 = int_to_ptr.vmem [resolvable:$true] %s301_s25 }
  0x28   : > { %p1086_p11 = pnand %p1097_p10, %p1633_p7  ;;  %s1663_s20 = scalar_lea.sflag [#allocation6], %s284_s14 }
  0x2a   : > { %p1219_p13 = pneg %p1086_p11 }
  0x2d   : > { %s297_s7 = scalar_lea.hbm %s1933_s1, %s1911_s6 }
  0x2e   : > { %s299_s2 = sshll.u32 %s297_s7, 4  ;;  %s300_s2 = int_to_ptr.hbm [resolvable:$true] %s299_s2 }
  0x2f   : > { %s1215_s15 = sshra.s32 %s300_s2, 4  ;;  %s1216_s15 = int_to_ptr.hbm [resolvable:$true] %s1215_s15 }
  0x30   : > { %s1217_s13 = scalar_lea.hbm %s1216_s15, 4  ;;  %p1223_p4 = scmp.lt.s32.totalorder %s1216_s15, %s1933_s1 }
  0x31   : > { %p1218_p12 = scmp.ne.s32.totalorder %s1216_s15, %s1217_s13 }
  0x33   : > { %p1220_p0 = pnand %p1219_p13, %p1218_p12 }
  0x35   : > { %p1221_p3 = pneg %p1220_p0 }
  0x37   : > { %p1226_p6 = pnand %p1223_p4, %p1221_p3 }
  0x39   : > { %1229 = shalt.err (!%p1226_p6)
}
  0x3a   : > { %1088 = dma.hbm_to_vmem [thread:$0]  (!%p1086_p11), %s300_s2, 64, %s302_s25, %s1663_s20  }
  0x3b   : > { %p915_p7 = scmp.ge.s32.totalorder %s1497_s10, 1  ;;  %p230_p12 = scmp.lt.s32.totalorder %s1497_s10, 5 }
  0x3c   : > { %s1934_s3 = sld [smem:[#allocation28_spill]]  ;;  %s1499_s2 = smov [#allocation8]  }
  0x3d   : > { %p1674_p13 = pnand %p915_p7, %p230_p12  ;;  %s243_s25 = sshll.u32 %s1499_s2, 4  ;;  %s244_s25 = int_to_ptr.vmem [resolvable:$true] %s243_s25 }
  0x3e   : > { %s1500_s13 = smov 128   ;;  %s1501_s18 = smov 8  }
  0x3f   : > { %p1078_p11 = pneg %p1674_p13  ;;  %s912_s14 = sadd.s32 4294967294, %s1497_s10  }
  0x40   : > { %s47_s15 = sadd.s32 1, %s1477_s29  ;;  %p54_p3 = scmp.ne.s32.totalorder %s1477_s29, %s1473_s28 }
  0x41   : > { %p1079_p0 = pnand %p1078_p11, %p1915_p2  ;;  %p60_p4 = scmp.ne.s32.totalorder %s1473_s28, %s1469_s27 }
  0x42   : > { %s241_s7 = sshll.u32 %s1934_s3, 4  ;;  %p217_p6 = scmp.eq.s32.totalorder %s1606_s11, 3  ;;  %s242_s7 = int_to_ptr.hbm [resolvable:$true] %s241_s7 }
  0x43   : > { %1081 = dma.hbm_to_vmem [thread:$0]  (!%p1079_p0), %s242_s7, 3072, %s244_s25, [#allocation9], %s1500_s13, %s1500_s13, %s1501_s18  }
  0x44   : > { %s1687_s24 = scalar_select %p45_p5, %s1477_s29, %s47_s15  }
  0x45   : > { %p223_p7 = scmp.eq.s32.totalorder %s912_s14, 3  ;;  %p1696_p12 = por %p55_p1, %p54_p3 }
  0x46   : > { %1936 = sst [smem:[#allocation24_spill]] %s1687_s24  ;;  %p1702_p11 = por %p1915_p2, %p60_p4 }
  0x47   : > { %p1706_p0 = por %p217_p6, %p54_p3  ;;  %p1710_p5 = por %p223_p7, %p60_p4 }
  0x48   : > { %s263_s7 = sand.u32 1, %s1477_s29   ;;  %s1941_s2 = sshll.u32 %s1493_s9, 1 }
  0x49   : > { %s1940_s30 = scalar_select %p1710_p5, 1, 0 }
  0x4a   : > { %s271_s25 = sadd.s32 %s1489_s8, %s1941_s2  ;;  %s918_s13 = sshll.u32 %s263_s7, 2 }
  0x4b   : > { %s920_s18 = sshll.u32 %s271_s25, 2  ;;  %s1942_s0 = sld [smem:[#allocation25_spill]] }
  0x4c   : > { %s267_s1 = scalar_lea.vmem [#allocation2], %s918_s13  ;;  %p1083_p3 = pnand %p1097_p10, %p1696_p12 }
  0x4d   : > { %s277_s3 = sshll.u32 %s267_s1, 4  ;;  %s264_s2 = scalar_lea.sflag [#allocation3], %s263_s7  ;;  %s278_s3 = int_to_ptr.vmem [resolvable:$true] %s277_s3 }
  0x4e   : > { %s115_s8 = sadd.s32 1, %s1453_s23  ;;  %p122_p4 = scmp.ne.s32.totalorder %s1453_s23, %s1449_s22 }
  0x4f   : > { %p128_p6 = scmp.ne.s32.totalorder %s1449_s22, %s1445_s21  ;;  %s310_s25 = sand.u32 1, %s1453_s23  }
  0x50   : > { %p124_p7 = por %p122_p4, %p55_p1  ;;  %s1944_s13 = sshll.u32 %s1493_s9, 3 }
  0x51   : > { %s273_s6 = scalar_lea.hbm %s1942_s0, %s920_s18  ;;  %p1735_p9 = por %p128_p6, %p1915_p2 }
  0x52   : > { %s275_s24 = sshll.u32 %s273_s6, 4  ;;  %s925_s6 = sshll.u32 %s310_s25, 2  ;;  %s276_s24 = int_to_ptr.hbm [resolvable:$true] %s275_s24 }
  0x53   : > { %1085 = dma.hbm_to_vmem [thread:$0]  (!%p1083_p3), %s276_s24, 64, %s278_s3, %s264_s2  }
  0x54   : > { %s1441_s18 = sadd.s32 4, %s1944_s13  ;;  %s312_s4 = scalar_lea.vmem [#allocation7], %s925_s6 }
  0x55   : > { %s325_s14 = sshll.u32 %s312_s4, 4  ;;  %p1945_p12 = scmp.eq.s32.totalorder %s1622_s16, 0  ;;  %s326_s14 = int_to_ptr.vmem [resolvable:$true] %s325_s14 }
  0x56   : > { %s1946_s15 = sld [smem:[#allocation27_spill]]  ;;  %p1089_p1 = pnand %p1097_p10, %p124_p7 }
  0x57   : > { %s1744_s7 = scalar_select %p1945_p12, %s1453_s23, %s115_s8  }
  0x58   : > { %p1309_p4 = pneg %p1089_p1 }
  0x5c   : > { %s321_s21 = scalar_lea.hbm %s1946_s15, %s1441_s18  ;;  %s1312_s8 = scalar_lea.hbm %s1946_s15, 16 }
  0x5d   : > { %s323_s2 = sshll.u32 %s321_s21, 4  ;;  %s324_s2 = int_to_ptr.hbm [resolvable:$true] %s323_s2 }
  0x5e   : > { %s1305_s0 = sshra.s32 %s324_s2, 4  ;;  %s1306_s0 = int_to_ptr.hbm [resolvable:$true] %s1305_s0 }
  0x5f   : > { %s1307_s29 = scalar_lea.hbm %s1306_s0, 4 }
  0x60   : > { %p1308_p3 = scmp.ne.s32.totalorder %s1306_s0, %s1307_s29  ;;  %p1314_p12 = scmp.lt.s32.totalorder %s1312_s8, %s1307_s29 }
  0x62   : > { %p1310_p6 = pnand %p1309_p4, %p1308_p3 }
  0x64   : > { %p1311_p2 = pneg %p1310_p6 }
  0x66   : > { %p1316_p5 = pnand %p1314_p12, %p1311_p2 }
  0x68   : > { %1319 = shalt.err (!%p1316_p5)
}
  0x69   : > { %1091 = dma.hbm_to_vmem [thread:$0]  (!%p1089_p1), %s324_s2, 64, %s326_s14, %s1663_s20  }
  0x6a   : > { %334 = sbr.rel (%p1674_p13) target bundleno = 311 (0x137), region = 44  ;;  %s1758_s6 = sand.u32 (!%p1674_p13), 1, %s1473_s28  }
  0x6b   : > { %s929_s0 = sshll.u32 (!%p1674_p13), %s1758_s6, 2  ;;  %s337_s13 = scalar_lea.sflag (!%p1674_p13), [#allocation3], %s1758_s6 }
  0x6c   : > { %s1762_s18 = scalar_lea.vmem (!%p1674_p13), [#allocation2], %s929_s0 }
  0x6f   : > { %1420 = dma.done.wait (%p1702_p11), %s337_s13, 64  }
  0x70   : > { %1422 = vsyncadd (%p1702_p11), %s337_s13, 4294967232  ;;  %s1947_s29 = sld [smem:[#allocation16_spill]]  ;;  %s346_s20 = sand.u32 1, %s1606_s11  }
  0x71   : > { %s347_s14 = scalar_lea.sflag [#allocation6], %s346_s20 }
  0x76   : > { %s348_s12 = sand.u32 1, %s1947_s29  }
  0x77   : > { %s1770_s4 = sshll.u32 %s348_s12, 2 }
  0x78   : > { %s350_s3 = scalar_lea.vmem [#allocation5], %s1770_s4 }
  0x79   : > { %1424 = dma.done.wait (%p1639_p8), %s347_s14, 64  }
  0x7a   : > { %1426 = vsyncadd (%p1639_p8), %s347_s14, 4294967232  ;;  %s358_s24 = sand.u32 1, %s1449_s22  }
  0x7b   : > { %s1778_s5 = sshll.u32 %s358_s24, 2 }
  0x7c   : > { %s360_s21 = scalar_lea.vmem [#allocation7], %s1778_s5 }
  0x7d   : > { %1428 = dma.done.wait (%p1735_p9), %s347_s14, 64  }
  0x7e   : > { %1430 = vsyncadd (%p1735_p9), %s347_s14, 4294967232  ;;  %p1948_p2 = scmp.eq.s32.totalorder %s1606_s11, 0 }
  0x80   : > { %1432 = dma.done.wait (%p1948_p2), [#allocation9], 3072   ;;  %p1949_p10 = pmov %p1948_p2 }
  0x81   : > { %s1950_s19 = sld [smem:[#allocation18_spill]]  ;;  %v960_v0 = vld [vmem:[#allocation8 + $0x70] sm:$0xf]  ;;  %v1057_v1 = vld [vmem:[#allocation8 + $0x74] sm:$0xf0]  ;;  %vm550_vm0 = vcmask 523264  }
  0x82   : > { %1434 = vsyncadd (%p1949_p10), [#allocation9], 4294964224  ;;  %v1056_v2 = vld [vmem:[#allocation8 + $0x74] sm:$0xf]  ;;  %v961_v3 = vor.u32 %v1057_v1, %v960_v0  ;;  %v962_v4 = vld [vmem:[#allocation8 + $0x78] sm:$0xf0] }
  0x83   : > { %v952_v5 = vld [vmem:[#allocation8 + $0x60] sm:$0xf]  ;;  %v1055_v6 = vld [vmem:[#allocation8 + $0x64] sm:$0xf0]  ;;  %v965_v7 = vor.u32 %v1056_v2, %v962_v4  ;;  %v1054_v8 = vld [vmem:[#allocation8 + $0x64] sm:$0xf] }
  0x84   : > { %v954_v9 = vld [vmem:[#allocation8 + $0x68] sm:$0xf0]  ;;  %v994_v10 = vld [vmem:[#allocation8 + $0x30] sm:$0xf]  ;;  %558 = vmatpush.bf16.msra.mxu0 %v961_v3  ;;  %v953_v11 = vor.u32 %v1055_v6, %v952_v5  ;;  %v1049_v12 = vld [vmem:[#allocation8 + $0x34] sm:$0xf0] }
  0x85   : > { %v1048_v13 = vld [vmem:[#allocation8 + $0x34] sm:$0xf]  ;;  %v996_v14 = vld [vmem:[#allocation8 + $0x38] sm:$0xf0]  ;;  %571 = vmatpush.bf16.msra.mxu1 %v965_v7  ;;  %v957_v15 = vor.u32 %v1054_v8, %v954_v9  ;;  %v995_v16 = vor.u32 %v1049_v12, %v994_v10  ;;  %v944_v18 = vld [vmem:[#allocation8 + $0x50] sm:$0xf] }
  0x86   : > { %v999_v17 = vor.u32 %v1048_v13, %v996_v14  ;;  %v1053_v19 = vld [vmem:[#allocation8 + $0x54] sm:$0xf0]  ;;  %v1052_v20 = vld [vmem:[#allocation8 + $0x54] sm:$0xf]  ;;  %v946_v21 = vld [vmem:[#allocation8 + $0x58] sm:$0xf0] }
  0x87   : > { %p413_p8 = scmp.gt.s32.totalorder %s1950_s19, 0  ;;  %p425_p13 = scmp.lt.s32.totalorder %s1950_s19, 1  ;;  %v986_v22 = vld [vmem:[#allocation8 + $0x20] sm:$0xf]  ;;  %v1047_v23 = vld [vmem:[#allocation8 + $0x24] sm:$0xf0]  ;;  %627 = vmatpush.bf16.msra.mxu2 %v995_v16  ;;  %v945_v27 = vor.u32 %v1053_v19, %v944_v18  ;;  %v949_v32 = vor.u32 %v1052_v20, %v946_v21 }
  0x88   : > { %640 = vmatpush.bf16.msra.mxu3 %v999_v17  ;;  %v987_v24 = vor.u32 %v1047_v23, %v986_v22  ;;  %v1046_v25 = vld [vmem:[#allocation8 + $0x24] sm:$0xf]  ;;  %v988_v26 = vld [vmem:[#allocation8 + $0x28] sm:$0xf0]  ;;  %559 = vmatpush.bf16.msra.mxu0 %v953_v11  ;;  %v936_v29 = vld [vmem:[#allocation8 + $0x40] sm:$0xf] }
  0x89   : > { %s1791_s2 = scalar_select %p413_p8, 1.0, 0.0  ;;  %v991_v28 = vor.u32 %v1046_v25, %v988_v26  ;;  %v1051_v30 = vld [vmem:[#allocation8 + $0x44] sm:$0xf0]  ;;  %v1050_v31 = vld [vmem:[#allocation8 + $0x44] sm:$0xf]  ;;  %572 = vmatpush.bf16.msra.mxu1 %v957_v15 }
  0x8a   : > { %s1794_s16 = scalar_select %p425_p13, 1.0, 0.0  ;;  %v978_v33 = vld [vmem:[#allocation8 + $0x10] sm:$0xf]  ;;  %v1045_v34 = vld [vmem:[#allocation8 + $0x14] sm:$0xf0]  ;;  %v937_v44 = vor.u32 %v1051_v30, %v936_v29 }
  0x8b   : > { %s417_s25 = sshrl.u32 %s1791_s2, 16  ;;  %v1044_v35 = vld [vmem:[#allocation8 + $0x14] sm:$0xf]  ;;  %v938_v36 = vld [vmem:[#allocation8 + $0x48] sm:$0xf0]  ;;  %628 = vmatpush.bf16.msra.mxu2 %v987_v24  ;;  %v979_v39 = vor.u32 %v1045_v34, %v978_v33  ;;  %p416_p9 = scmp.ne.f32.partialorder %s1791_s2, %s1791_s2  ;;  %vm474_vm1 = vcmask 1040384  }
  0x8c   : > { %s1796_s8 = sand.u32 1, %s417_s25  ;;  %v980_v37 = vld [vmem:[#allocation8 + $0x18] sm:$0xf0]  ;;  %v1028_v38 = vld [vmem:[#allocation8 + $0xb0] sm:$0xf]  ;;  %641 = vmatpush.bf16.msra.mxu3 %v991_v28  ;;  %560 = vmatpush.bf16.msra.mxu0 %v945_v27  ;;  %v941_v48 = vor.u32 %v1050_v31, %v938_v36  ;;  %s429_s13 = sshrl.u32 %s1794_s16, 16 }
  0x8d   : > { %s419_s11 = sadd.s32 32767, %s1796_s8  ;;  %v983_v40 = vor.u32 %v1044_v35, %v980_v37  ;;  %v1065_v41 = vld [vmem:[#allocation8 + $0xb4] sm:$0xf0]  ;;  %v1064_v42 = vld [vmem:[#allocation8 + $0xb4] sm:$0xf]  ;;  %573 = vmatpush.bf16.msra.mxu1 %v949_v32  ;;  %p428_p11 = scmp.ne.f32.partialorder %s1794_s16, %s1794_s16  ;;  %vm489_vm4 = vcmask 1043456  }
  0x8e   : > { %v1030_v43 = vld [vmem:[#allocation8 + $0xb8] sm:$0xf0]  ;;  %s420_s1 = sadd.s32 %s419_s11, %s1791_s2  ;;  %v412_v45 = vld [vmem:[%s1762_s18] sm:$0xf]  ;;  %v970_v46 = vld [vmem:[#allocation8] sm:$0xf]  ;;  %v1029_v49 = vor.u32 %v1065_v41, %v1028_v38 }
  0x8f   : > { %v1043_v47 = vld [vmem:[#allocation8 + $0x4] sm:$0xf0]  ;;  %v1042_v50 = vld [vmem:[#allocation8 + $0x4] sm:$0xf]  ;;  %v972_v51 = vld [vmem:[#allocation8 + $0x8] sm:$0xf0]  ;;  %v1033_v52 = vor.u32 %v1064_v42, %v1030_v43  ;;  %629 = vmatpush.bf16.msra.mxu2 %v979_v39  ;;  %v464_v55 = vunpack.c.l.b16 %v412_v45 }
  0x90   : > { %v1020_v53 = vld [vmem:[#allocation8 + $0xa0] sm:$0xf]  ;;  %v1063_v54 = vld [vmem:[#allocation8 + $0xa4] sm:$0xf0]  ;;  %s421_s0 = sand.u32 4294901760, %s420_s1  ;;  %642 = vmatpush.bf16.msra.mxu3 %v983_v40  ;;  %v971_v56 = vor.u32 %v1043_v47, %v970_v46  ;;  %561 = vmatpush.bf16.msra.mxu0 %v937_v44  ;;  %v975_v59 = vor.u32 %v1042_v50, %v972_v51  ;;  %s430_s29 = sand.u32 1, %s429_s13 }
  0x91   : > { %v1062_v57 = vld [vmem:[#allocation8 + $0xa4] sm:$0xf]  ;;  %v1022_v58 = vld [vmem:[#allocation8 + $0xa8] sm:$0xf0]  ;;  %s1983_s0 = smov (%p416_p9, %s421_s0), 2143289344  ;;  %574 = vmatpush.bf16.msra.mxu1 %v941_v48  ;;  %v1021_v61 = vor.u32 %v1063_v54, %v1020_v53  ;;  %s431_s12 = sadd.s32 32767, %s430_s29  ;;  %v465_v1 = vpack.c.b16 %v464_v55, %v464_v55 }
  0x92   : > { %v437_v60 = vld [vmem:[%s350_s3] sm:$0x8]  ;;  %s424_s18 = sshrl.u32 %s1983_s0, 16  ;;  %v1025_v62 = vor.u32 %v1062_v57, %v1022_v58  ;;  %v1061_v0 = vld [vmem:[#allocation8 + $0x94] sm:$0xf0]  ;;  %s432_s14 = sadd.s32 %s431_s12, %s1794_s16 }
  0x93   : > { %s438_s20 = sshll.u32 %s424_s18, 16  ;;  %v1012_v63 = vld [vmem:[#allocation8 + $0x90] sm:$0xf]  ;;  %966 = vmatmul.msk.bf16.vlgmr.msra.gmra.mxu0 %vm550_vm0, %v412_v45  ;;  %630 = vmatpush.bf16.msra.mxu2 %v971_v56  ;;  %v442_v2 = vunpack.c.l.bf16 %v437_v60  ;;  %v1060_v3 = vld [vmem:[#allocation8 + $0x94] sm:$0xf]  ;;  %s433_s3 = sand.u32 4294901760, %s432_s14 }
  0x94   : > { %705 = vmatpush.bf16.msrb.mxu0 %v1029_v49  ;;  %s439_s4 = sor.u32 %s438_s20, %s424_s18  ;;  %v1014_v4 = vld [vmem:[#allocation8 + $0x98] sm:$0xf0]  ;;  %967 = vmatmul.msk.bf16.vlgmr.msra.gmra.mxu1 %vm550_vm0, %v412_v45  ;;  %v1013_v7 = vor.u32 %v1061_v0, %v1012_v63  ;;  %s1985_s3 = smov (%p428_p11, %s433_s3), 2143289344  ;;  %v1004_v9 = vld [vmem:[#allocation8 + $0x80] sm:$0xf]  ;;  %v467_v12 = vshrl.u32 %v465_v1, 16 }
  0x95   : > { %718 = vmatpush.bf16.msrb.mxu1 %v1033_v52  ;;  %643 = vmatpush.bf16.msra.mxu3 %v975_v59  ;;  %v440_v5 = vstv %s439_s4  ;;  %v1017_v8 = vor.u32 %v1060_v3, %v1014_v4  ;;  %v1059_v10 = vld [vmem:[#allocation8 + $0x84] sm:$0xf0]  ;;  %v446_v11 = vld [vmem:[%s360_s21] sm:$0x1]  ;;  %v1058_v14 = vld [vmem:[#allocation8 + $0x84] sm:$0xf] }
  0x96   : > { %v443_v6 = vunpack.c.l.bf16 %v440_v5  ;;  %v1006_v15 = vld [vmem:[#allocation8 + $0x88] sm:$0xf0]  ;;  %s436_s24 = sshrl.u32 %s1985_s3, 16  ;;  %v1005_v17 = vor.u32 %v1059_v10, %v1004_v9  ;;  %v451_v18 = vunpack.c.l.bf16 %v446_v11  ;;  %v470_v21 = vshll.u32 %v465_v1, 16  ;;  %s1951_s5 = sld [smem:[#allocation19_spill]] }
  0x97   : > { %s447_s2 = sshll.u32 %s436_s24, 16  ;;  %v1009_v19 = vor.u32 %v1058_v14, %v1006_v15  ;;  %v469_v23 = vrot.slane %v467_v12, 7  ;;  %vm475_vm2 = vsmask.f32 256  ;;  %vm490_vm5 = vsmask.f32 3328 }
  0x98   : > { %706 = vmatpush.bf16.msrb.mxu0 %v1021_v61  ;;  %v444_v13 = vmul.f32 %v443_v6, %v442_v2  ;;  %s448_s25 = sor.u32 %s447_s2, %s436_s24  ;;  %vm476_vm3 = vmand %vm474_vm1, %vm475_vm2  ;;  %v478_v30 = vrot.slane %v470_v21, 1  ;;  %s1037_s21 = sshll.u32 %s1950_s19, 1 }
  0x99   : > { %719 = vmatpush.bf16.msrb.mxu1 %v1025_v62  ;;  %v449_v20 = vstv %s448_s25  ;;  %v472_v28 = vor.u32 %v470_v21, %v469_v23  ;;  %vm491_vm6 = vmand %vm489_vm4, %vm490_vm5  ;;  %s1952_s1 = sld [smem:[#allocation29_spill]]  ;;  %s933_s20 = sshll.u32 %s1758_s6, 4 }
  0x9a   : > { %v445_v16 = vpack.c.bf16 %v444_v13, %v444_v13  ;;  %v452_v24 = vunpack.c.l.bf16 %v449_v20  ;;  %v479_v35 = vor.u32 %v478_v30, %v467_v12  ;;  %s1953_s29 = sld [smem:[#allocation30_spill]]  ;;  %s404_s24 = scalar_lea.vmem [#allocation10], %s933_s20 }
  0x9b   : > { %s1954_s14 = sld [smem:[#allocation31_spill]]  ;;  %s765_s2 = sshll.u32 %s404_s24, 4  ;;  %s766_s2 = int_to_ptr.vmem [resolvable:$true] %s765_s2 }
  0x9c   : > { %707 = vmatpush.bf16.msrb.mxu0 %v1013_v7  ;;  %v456_v22 = vunpack.c.l.b16 %v445_v16  ;;  %v453_v26 = vmul.f32 %v452_v24, %v451_v18  ;;  %s1038_s16 = sshll.u32 %s1951_s5, 2  ;;  %s750_s5 = scalar_lea.sflag [#allocation4], %s1758_s6 }
  0x9d   : > { %720 = vmatpush.bf16.msrb.mxu1 %v1017_v8  ;;  %s761_s0 = sadd.s32 %s1038_s16, %s1037_s21 }
  0x9e   : > { %v457_v25 = vpack.c.b16 %v456_v22, %v456_v22  ;;  %v454_v29 = vpack.c.bf16 %v453_v26, %v453_v26  ;;  %s1039_s19 = sshll.u32 %s761_s0, 3 }
  0x9f   : > { %v729_v43 = vld [vmem:[%s1952_s1] sm:$0x3] }
  0xa0   : > { %708 = vmatpush.bf16.msrb.mxu0 %v1005_v17  ;;  %v459_v27 = vshrl.u32 %v457_v25, 16  ;;  %v482_v32 = vunpack.c.l.b16 %v454_v29  ;;  %v737_v46 = vld [vmem:[%s1953_s29] sm:$0x3]  ;;  %v731_v50 = vperm.slane %v729_v43, 0  ;;  %v732_v52 = vperm.slane %v729_v43, 1 }
  0xa1   : > { %721 = vmatpush.bf16.msrb.mxu1 %v1009_v19  ;;  %v739_v54 = vperm.slane %v737_v46, 0  ;;  %v740_v56 = vperm.slane %v737_v46, 1  ;;  %s763_s3 = scalar_lea.hbm %s1954_s14, %s1039_s19  ;;  %s1355_s1 = scalar_lea.hbm %s1954_s14, 64 }
  0xa2   : > { %v461_v31 = vrot.slane %v459_v27, 3  ;;  %v483_v34 = vpack.c.b16 %v482_v32, %v482_v32  ;;  %s767_s25 = sshll.u32 %s763_s3, 4  ;;  %s768_s25 = int_to_ptr.hbm [resolvable:$true] %s767_s25 }
  0xa3   : > { %s1349_s21 = sshra.s32 %s768_s25, 4  ;;  %s1350_s21 = int_to_ptr.hbm [resolvable:$true] %s1349_s21 }
  0xa4   : > { %v477_v33 = vsel %vm476_vm3, %v461_v31, %v472_v28  ;;  %v485_v36 = vshll.u32 %v483_v34, 16  ;;  %s1351_s16 = scalar_lea.hbm %s1350_s21, 16  ;;  %p1356_p3 = scmp.lt.s32.totalorder %s1350_s21, %s1954_s14 }
  0xa5   : > { %1000 = vmatmul.msk.bf16.vlgmr.msra.gmra.mxu2 %vm550_vm0, %v477_v33  ;;  %1001 = vmatmul.msk.bf16.vlgmr.msra.gmra.mxu3 %vm550_vm0, %v477_v33  ;;  %p1352_p5 = scmp.ne.s32.totalorder %s1350_s21, %s1351_s16  ;;  %p1357_p4 = scmp.lt.s32.totalorder %s1355_s1, %s1351_s16 }
  0xa6   : > { %v487_v37 = vrot.slane %v485_v36, 5 }
  0xa7   : > { %p1353_p7 = pnand %p1352_p5, %p1706_p0  ;;  %p1358_p6 = por %p1357_p4, %p1356_p3 }
  0xa8   : > { %v492_v38 = vsel %vm491_vm6, %v479_v35, %v487_v37 }
  0xa9   : > { %1034 = vmatmul.msk.bf16.vlgmr.msrb.gmra.mxu0 %vm550_vm0, %v492_v38  ;;  %1035 = vmatmul.msk.bf16.vlgmr.msrb.gmra.mxu1 %vm550_vm0, %v492_v38  ;;  %p1354_p1 = pneg %p1353_p7 }
  0xab   : > { %p1359_p12 = pnand %p1358_p6, %p1354_p1 }
 0x110   : > { %v563_v39 = vpop.f32.mrf.mxu0 }
 0x111   : > { %v576_v40 = vpop.f32.mrf.mxu1 }
 0x118   : > { %v565_v41 = vpop.f32.mrf.mxu0 }
 0x119   : > { %v578_v42 = vpop.f32.mrf.mxu1 }
 0x126   : > { %v710_v49 = vpop.f32.mrf.mxu0  ;;  %v723_v51 = vpop.f32.mrf.mxu1 }
 0x128   : > { %v632_v44 = vpop.f32.mrf.mxu2  ;;  %v645_v45 = vpop.f32.mrf.mxu3 }
 0x129   : > { %v633_v47 = vadd.f32 %v632_v44, %v563_v39  ;;  %v646_v48 = vadd.f32 %v645_v45, %v576_v40 }
 0x12b   : > { %v727_v53 = vadd.f32 %v710_v49, %v633_v47  ;;  %v728_v55 = vadd.f32 %v723_v51, %v646_v48 }
 0x12d   : > { %v735_v57 = vmul.f32 %v731_v50, %v727_v53  ;;  %v736_v58 = vmul.f32 %v732_v52, %v728_v55 }
 0x12e   : > { %v712_v1 = vpop.f32.mrf.mxu0  ;;  %v725_v2 = vpop.f32.mrf.mxu1 }
 0x12f   : > { %v743_v59 = vadd.f32 %v739_v54, %v735_v57  ;;  %v744_v60 = vadd.f32 %v740_v56, %v736_v58 }
 0x130   : > { %v634_v61 = vpop.f32.mrf.mxu2  ;;  %v647_v62 = vpop.f32.mrf.mxu3 }
 0x131   : > { %v745_v63 = vmax.f32 %v743_v59, 0.0  ;;  %v746_v0 = vmax.f32 %v744_v60, 0.0 }
 0x133   : > { %747 = vst [vmem:[%s404_s24] sm:$0xff] %v745_v63 }
 0x134   : > { %748 = vst [vmem:[%s404_s24 + $0x8] sm:$0xff] %v746_v0 }
 0x135   : > { %1362 = shalt.err (!%p1359_p12)
}
 0x136   : > { %1076 = dma.vmem_to_hbm [thread:$0]  (%p1706_p0), %s766_s2, 256, %s768_s25, %s750_s5  }
 0x137 PF: > { %p1099_p2 = scmp.ge.s32.totalorder %s1497_s10, 2  ;;  %s779_s6 = sand.u32 1, %s1469_s27  }
 0x138   : > { %p1955_p10 = scmp.ne.s32.totalorder %s1940_s30, 0  ;;  %s780_s18 = scalar_lea.sflag [#allocation4], %s779_s6 }
 0x13a   : > { %p1093_p8 = pnand %p1099_p2, %p1955_p10 }
 0x13c   : > { %p1094_p13 = pneg %p1093_p8 }
 0x13e   : > { %1436 = dma.done.wait (%p1094_p13), %s780_s18, 256  }
 0x13f   : > { %1438 = vsyncadd (%p1094_p13), %s780_s18, 4294967040  ;;  %s26_s10 = sadd.s32 1, %s1497_s10   ;;  %s1957_s24 = sld [smem:[#allocation16_spill]] }
 0x140   : > { %p1851_p9 = scmp.ge.s32.totalorder %s26_s10, 6   ;;  %s1958_s17 = sld [smem:[#allocation23_spill]] }
 0x141   : > { %s1959_s20 = sld [smem:[#allocation17_spill]]  ;;  %s1965_s21 = smov %s1449_s22 }
 0x142   : > { %s1960_s30 = sld [smem:[#allocation24_spill]]  ;;  %s1966_s22 = smov %s1453_s23 }
 0x143   : > { %s1961_s19 = sld [smem:[#allocation20_spill]]  ;;  %s1967_s23 = smov %s1744_s7 }
 0x144   : > { %s1962_s8 = sld [smem:[#allocation21_spill]]  ;;  %s1968_s25 = smov %s1465_s26 }
 0x145   : > { %s1963_s12 = sld [smem:[#allocation22_spill]]  ;;  %s1970_s27 = smov %s1473_s28 }
 0x146   : > { %s1969_s26 = smov %s1958_s17  ;;  %s1974_s7 = smov %s1493_s9 }
 0x147   : > { %s1971_s28 = smov %s1959_s20  ;;  %25 = sbr.rel (!%p1851_p9) target bundleno = 21 (0x15), region = 119 }
 0x148   : > { %s1972_s29 = smov %s1960_s30 }
 0x149   : > { %s1973_s30 = smov %s1961_s19 }
 0x14b   : > { %s1975_s9 = smov %s1963_s12 }
 0x14c   :  { %786 = vsyncpa [#allocation3], 1 }
 0x14d   :  { %788 = vsyncpa [#allocation3 + $0x1], 1 }
 0x14e   :  { %789 = vsyncpa [#allocation6], 1 }
 0x14f   :  { %791 = vsyncpa [#allocation6 + $0x1], 1 }
 0x150   :  { %792 = vsyncpa [#allocation9], 1 }
 0x151   :  { %793 = vsyncpa [#allocation4], 1 }
 0x152   :  { %795 = vsyncpa [#allocation4 + $0x1], 1 }

</bundles_post_ra>
